<compile_context>
chip_gen: v7x
topology: tpu7x:2x2x1
jax: 0.10.0
libtpu: 0.0.40
codegen_flags: <defaults>
</compile_context>

<pallas_src>
import functools

import jax
import jax.numpy as jnp
from jax.experimental import pallas as pl
from jax.experimental.pallas import tpu as pltpu

BN_EPS = 1e-5

# Per-pipeline-buffer VMEM budget. With double-buffered x-in + out blocks this keeps
# each pallas_call around ~16 MiB of VMEM, safely under the 32 MiB scoped limit we
# request on v5e / v6e / v7x alike (v7x has only 64 MiB physical VMEM).
_BLOCK_BUDGET_BYTES = 4 * 1024 * 1024
_VMEM_LIMIT_BYTES = 32 * 1024 * 1024


def _pick_s_tile(c, s, itemsize, budget=_BLOCK_BUDGET_BYTES):
    """Lane tile for the flattened spatial axis.

    Multiple of 128 sized so a (1, C, s_tile) block fits `budget`; if the whole
    spatial extent fits, use it directly (full-dim block, no 128-multiple needed).
    """
    cap = max(128, (budget // max(1, c * itemsize)) // 128 * 128)
    return s if s <= cap else cap


# --------------------------------------------------------------------------------------
# Pass 1: per-(batch, channel) spatial mean, tiled reduction over S.
# Grid: (B, n_s_tiles), batch 'parallel', spatial reduction 'arbitrary' (last).
# Accumulator is sublane-major (1, C, 1) so the per-tile lane reduce lands directly
# in it without a cross-lane relayout.
# --------------------------------------------------------------------------------------
def _mean_kernel(s_total, inv_s, needs_mask, x_ref, mean_ref, acc_ref):
    # x_ref: (1, C, s_tile)   mean_ref: (1, C, 1)   acc_ref: (1, C, 1) f32 scratch
    si = pl.program_id(1)

    @pl.when(si == 0)
    def _():
        acc_ref[...] = jnp.zeros_like(acc_ref)

    x = x_ref[...].astype(jnp.float32)                                  # (1, C, s_tile)
    if needs_mask:
        # Last tile may extend past S; zero the out-of-bounds lanes so they do not
        # contribute to the sum (input block padding contains garbage, not zeros).
        lane = jax.lax.broadcasted_iota(jnp.int32, x.shape, 2)
        x = jnp.where(si * x.shape[-1] + lane < s_total, x, 0.0)
    acc_ref[...] += jnp.sum(x, axis=-1, keepdims=True)                  # (1, C, 1)

    @pl.when(si == pl.num_programs(1) - 1)
    def _():
        mean_ref[...] = acc_ref[...] * inv_s


# --------------------------------------------------------------------------------------
# Pass 2: out = x * scale   (scale = 1 + gate), pure HBM-bandwidth-bound elementwise.
# Grid: (B, n_s_tiles), all axes 'parallel'. Partial last S block: writes are clipped.
# --------------------------------------------------------------------------------------
def _apply_kernel(x_ref, scale_ref, o_ref):
    # x_ref: (1, C, s_tile)   scale_ref: (1, C, 1)   o_ref: (1, C, s_tile)
    o_ref[...] = x_ref[...] * scale_ref[...]


def se_layer_coc(x, w1, gamma1, beta1, rm1, rv1, w2, gamma2, beta2, rm2, rv2,
                 *, eps=BN_EPS, block_budget_bytes=_BLOCK_BUDGET_BYTES):
    """SELayerCoC forward.

    x: (B, C, T, H, W); w1: (C//r, C) conv1 weight; w2: (C, C//r) conv2 weight;
    BN params are per-feature vectors (eval-mode running statistics).
    """
    b, c, t, h, w = x.shape
    s = t * h * w
    x_flat = x.reshape(b, c, s)

    itemsize = jnp.dtype(x.dtype).itemsize
    s_tile = _pick_s_tile(c, s, itemsize, block_budget_bytes)
    n_s = pl.cdiv(s, s_tile)
    needs_mask = (s % s_tile) != 0

    # ---- pass 1: per-(batch, channel) spatial mean
    mean = pl.pallas_call(
        functools.partial(_mean_kernel, s, 1.0 / float(s), needs_mask),
        out_shape=jax.ShapeDtypeStruct((b, c, 1), jnp.float32),
        grid_spec=pltpu.PrefetchScalarGridSpec(
            num_scalar_prefetch=0,
            grid=(b, n_s),
            in_specs=[pl.BlockSpec((1, c, s_tile), lambda bi, si: (bi, 0, si))],
            out_specs=pl.BlockSpec((1, c, 1), lambda bi, si: (bi, 0, 0)),
            scratch_shapes=[pltpu.VMEM((1, c, 1), jnp.float32)],
        ),
        compiler_params=pltpu.CompilerParams(
            dimension_semantics=("parallel", "arbitrary"),
            vmem_limit_bytes=_VMEM_LIMIT_BYTES),
    )(x_flat)

    # ---- gate: fold eval-mode BN into the 1x1x1 convs and apply them (factored) to
    # the pooled mean in plain JAX — O(B*C*C/r) flops, trivially cheap, keeps the
    # (C, C) dense weight out of the reduction kernel's VMEM.
    f32 = jnp.float32
    a1 = gamma1.astype(f32) * jax.lax.rsqrt(rv1.astype(f32) + eps)        # (Cr,)
    w1f = w1.astype(f32) * a1[:, None]                                    # (Cr, C)
    b1f = beta1.astype(f32) - rm1.astype(f32) * a1                        # (Cr,)
    a2 = gamma2.astype(f32) * jax.lax.rsqrt(rv2.astype(f32) + eps)        # (C,)
    w2f = w2.astype(f32) * a2[:, None]                                    # (C, Cr)
    b2f = beta2.astype(f32) - rm2.astype(f32) * a2                        # (C,)

    m = mean[..., 0]                                                      # (B, C)
    y1 = m @ w1f.T + b1f                                                  # (B, Cr)
    z = y1 @ w2f.T + b2f                                                  # (B, C)
    # scale = 1 + gate = sigmoid(z) + 0.5, cast once so pass 2 is a single multiply
    # in the input dtype.
    scale = (jax.nn.sigmoid(z) + 0.5).astype(x.dtype).reshape(b, c, 1)

    # ---- pass 2: recalibration, lane-dense blocks, no pad / slice round trips
    out_flat = pl.pallas_call(
        _apply_kernel,
        out_shape=jax.ShapeDtypeStruct((b, c, s), x.dtype),
        grid_spec=pltpu.PrefetchScalarGridSpec(
            num_scalar_prefetch=0,
            grid=(b, n_s),
            in_specs=[
                pl.BlockSpec((1, c, s_tile), lambda bi, si: (bi, 0, si)),
                pl.BlockSpec((1, c, 1), lambda bi, si: (bi, 0, 0)),
            ],
            out_specs=pl.BlockSpec((1, c, s_tile), lambda bi, si: (bi, 0, si)),
        ),
        compiler_params=pltpu.CompilerParams(
            dimension_semantics=("parallel", "parallel"),
            vmem_limit_bytes=_VMEM_LIMIT_BYTES),
    )(x_flat, scale)

    return out_flat.reshape(b, c, t, h, w)


# --------------------------------------------------------------------------------------
# Pure-JAX reference (follows the PyTorch op order exactly, eval-mode BN).
# --------------------------------------------------------------------------------------
def _bcast(v):
    return v[None, :, None, None, None]


def _reference(x, w1, gamma1, beta1, rm1, rv1, w2, gamma2, beta2, rm2, rv2, eps=BN_EPS):
    y = jnp.einsum("oc,bcthw->bothw", w1, x)
    y = (y - _bcast(rm1)) * _bcast(jax.lax.rsqrt(rv1 + eps)) * _bcast(gamma1) + _bcast(beta1)
    y = jnp.mean(y, axis=(2, 3, 4), keepdims=True)
    y = jnp.einsum("oc,bcthw->bothw", w2, y)
    y = (y - _bcast(rm2)) * _bcast(jax.lax.rsqrt(rv2 + eps)) * _bcast(gamma2) + _bcast(beta2)
    y = jax.nn.sigmoid(y) - 0.5
    return x + x * y


def _make_params(key, c, r):
    cr = c // r
    keys = jax.random.split(key, 11)
    w1 = 0.3 * jax.random.normal(keys[0], (cr, c), dtype=jnp.float32)
    w2 = 0.3 * jax.random.normal(keys[1], (c, cr), dtype=jnp.float32)
    gamma1 = 1.0 + 0.1 * jax.random.normal(keys[2], (cr,), dtype=jnp.float32)
    beta1 = 0.1 * jax.random.normal(keys[3], (cr,), dtype=jnp.float32)
    rm1 = 0.1 * jax.random.normal(keys[4], (cr,), dtype=jnp.float32)
    rv1 = jnp.abs(1.0 + 0.1 * jax.random.normal(keys[5], (cr,), dtype=jnp.float32))
    gamma2 = 1.0 + 0.1 * jax.random.normal(keys[6], (c,), dtype=jnp.float32)
    beta2 = 0.1 * jax.random.normal(keys[7], (c,), dtype=jnp.float32)
    rm2 = 0.1 * jax.random.normal(keys[8], (c,), dtype=jnp.float32)
    rv2 = jnp.abs(1.0 + 0.1 * jax.random.normal(keys[9], (c,), dtype=jnp.float32))
    return (w1, gamma1, beta1, rm1, rv1, w2, gamma2, beta2, rm2, rv2)


if __name__ == "__main__":
    key = jax.random.PRNGKey(0)
    k_x1, k_p1, k_x2, k_p2 = jax.random.split(key, 4)

    # Case 1: S a multiple of 128 (single full-extent S block).
    B, C, T, H, W = 2, 32, 4, 8, 8
    x = jax.random.normal(k_x1, (B, C, T, H, W), dtype=jnp.float32)
    params = _make_params(k_p1, C, 16)
    out = jax.block_until_ready(se_layer_coc(x, *params))
    ref = _reference(x, *params)
    assert out.shape == (B, C, T, H, W)
    assert jnp.allclose(out, ref, atol=1e-4, rtol=1e-4), "case 1 mismatch vs. reference"

    # Case 2: S = 147 (not a multiple of 128) with a tiny block budget to force
    # s_tile = 128 — exercises the masked partial last tile and clipped output writes.
    B2, C2, T2, H2, W2 = 1, 16, 3, 7, 7
    x2 = jax.random.normal(k_x2, (B2, C2, T2, H2, W2), dtype=jnp.float32)
    params2 = _make_params(k_p2, C2, 4)
    out2 = jax.block_until_ready(se_layer_coc(x2, *params2, block_budget_bytes=8192))
    ref2 = _reference(x2, *params2)
    assert out2.shape == (B2, C2, T2, H2, W2)
    assert jnp.allclose(out2, ref2, atol=1e-4, rtol=1e-4), "case 2 mismatch vs. reference"

    print("KERNEL_OK")
</pallas_src>

<mosaic_0001>
module attributes {stable_mosaic.version = 11 : i64} {
  func.func @_mean_kernel(%arg0: i32, %arg1: i32, %arg2: memref<1x32x256xf32, #tpu.memory_space<vmem>>, %arg3: memref<1x32x1xf32, #tpu.memory_space<vmem>>, %arg4: memref<1x32x1xf32, #tpu.memory_space<vmem>>) attributes {dimension_semantics = [#tpu.dimension_semantics<parallel>, #tpu.dimension_semantics<arbitrary>], iteration_bounds = array<i64: 2, 1>, scalar_prefetch = 0 : i64, scratch_operands = 1 : i64, tpu.core_type = #tpu.core_type<tc>, window_params = [{transform_indices = @transform_0, window_bounds = array<i64: 1, 32, 256>}, {transform_indices = @transform_1, window_bounds = array<i64: 1, 32, 1>}]} {
    %c0_i32 = arith.constant 0 : i32
    %0 = arith.cmpi eq, %arg1, %c0_i32 : i32
    %1 = arith.extui %0 : i1 to i32
    %c0_i32_0 = arith.constant 0 : i32
    %2 = arith.cmpi ne, %1, %c0_i32_0 : i32
    scf.if %2 {
      %cst_11 = arith.constant 0.000000e+00 : f32
      %12 = vector.broadcast %cst_11 : f32 to vector<1x32x1xf32>
      %c0_12 = arith.constant 0 : index
      %c0_13 = arith.constant 0 : index
      %c0_14 = arith.constant 0 : index
      %13 = vector.load %arg4[%c0_12, %c0_13, %c0_14] : memref<1x32x1xf32, #tpu.memory_space<vmem>>, vector<1x32x1xf32>
      tpu.vector_store %arg4[%c0_12, %c0_13, %c0_14], %12 {strides = array<i32>} : memref<1x32x1xf32, #tpu.memory_space<vmem>>, vector<1x32x1xf32>,
    } else {
    }
    %c0 = arith.constant 0 : index
    %c0_1 = arith.constant 0 : index
    %c0_2 = arith.constant 0 : index
    %3 = vector.load %arg2[%c0, %c0_1, %c0_2] : memref<1x32x256xf32, #tpu.memory_space<vmem>>, vector<1x32x256xf32>
    %c0_3 = arith.constant 0 : index
    %c0_4 = arith.constant 0 : index
    %c0_5 = arith.constant 0 : index
    %4 = vector.load %arg4[%c0_3, %c0_4, %c0_5] : memref<1x32x1xf32, #tpu.memory_space<vmem>>, vector<1x32x1xf32>
    %cst = arith.constant dense<0.000000e+00> : vector<1x32xf32>
    %5 = vector.multi_reduction <add>, %3, %cst [2] : vector<1x32x256xf32> to vector<1x32xf32>
    %6 = vector.shape_cast %5 : vector<1x32xf32> to vector<1x32x1xf32>
    %7 = arith.addf %4, %6 : vector<1x32x1xf32>
    %c0_6 = arith.constant 0 : index
    %c0_7 = arith.constant 0 : index
    %c0_8 = arith.constant 0 : index
    %8 = vector.load %arg4[%c0_6, %c0_7, %c0_8] : memref<1x32x1xf32, #tpu.memory_space<vmem>>, vector<1x32x1xf32>
    tpu.vector_store %arg4[%c0_6, %c0_7, %c0_8], %7 {strides = array<i32>} : memref<1x32x1xf32, #tpu.memory_space<vmem>>, vector<1x32x1xf32>,
    %c0_i32_9 = arith.constant 0 : i32
    %9 = arith.cmpi eq, %arg1, %c0_i32_9 : i32
    %10 = arith.extui %9 : i1 to i32
    %c0_i32_10 = arith.constant 0 : i32
    %11 = arith.cmpi ne, %10, %c0_i32_10 : i32
    scf.if %11 {
      %c0_11 = arith.constant 0 : index
      %c0_12 = arith.constant 0 : index
      %c0_13 = arith.constant 0 : index
      %12 = vector.load %arg4[%c0_11, %c0_12, %c0_13] : memref<1x32x1xf32, #tpu.memory_space<vmem>>, vector<1x32x1xf32>
      %cst_14 = arith.constant 3.906250e-03 : f32
      %13 = vector.broadcast %cst_14 : f32 to vector<1x32x1xf32>
      %14 = arith.mulf %12, %13 : vector<1x32x1xf32>
      %c0_15 = arith.constant 0 : index
      %c0_16 = arith.constant 0 : index
      %c0_17 = arith.constant 0 : index
      %15 = vector.load %arg3[%c0_15, %c0_16, %c0_17] : memref<1x32x1xf32, #tpu.memory_space<vmem>>, vector<1x32x1xf32>
      tpu.vector_store %arg3[%c0_15, %c0_16, %c0_17], %14 {strides = array<i32>} : memref<1x32x1xf32, #tpu.memory_space<vmem>>, vector<1x32x1xf32>,
    } else {
    }
    return
  }
  func.func @transform_0(%arg0: i32, %arg1: i32) -> (i32, i32, i32) {
    %c0_i32 = arith.constant 0 : i32
    %c0_i32_0 = arith.constant 0 : i32
    return %arg0, %c0_i32, %arg1 : i32, i32, i32
  }
  func.func @transform_1(%arg0: i32, %arg1: i32) -> (i32, i32, i32) {
    %c0_i32 = arith.constant 0 : i32
    %c0_i32_0 = arith.constant 0 : i32
    %c0_i32_1 = arith.constant 0 : i32
    return %arg0, %c0_i32, %c0_i32_0 : i32, i32, i32
  }
}

</mosaic_0001>

<bundles_post_ra>
// kernel: tpu_custom_call.1
= control target key start
LH: loop header
LB: loop body
LE: loop exit
PB: predicated region body
PF: predicated region fallthrough
CT: control target
= control target key end

     0   :  { %6 = vsyncpa [#allocation4], 0  ;;  %s594_s0 = inlined_call_operand.hbm [shape: f32[2,32,256], index: 0, kind: input, shape index: {}]   ;;  %s595_s1 = inlined_call_operand.vmem [shape: f32[2,32,1], index: 1, kind: output, shape index: {}]  }
   0x1   :  { %8 = vsyncpa [#allocation4 + $0x1], 0  ;;  %s458_s6 = smov 0   ;;  %s460_s7 = smov 0  }
   0x2   :  { %s462_s8 = smov 0   ;;  %s464_s9 = smov 0  }
   0x3   :  { %s466_s10 = smov 0   ;;  %s468_s11 = smov 0  }
   0x4 LB: > { %s289_s12 = sadd.s32 4294967295, %s442_s11   ;;  %s26_s13 = sadd.s32 1, %s438_s10  ;;  %s442_s11 = sphi %s468_s11, %s14_s11   ;;  %s438_s10 = sphi %s466_s10, %s603_s10   ;;  %s434_s9 = sphi %s464_s9, %s602_s9   ;;  %s430_s8 = sphi %s462_s8, %s601_s8   ;;  %s426_s7 = sphi %s460_s7, %s600_s7   ;;  %s422_s6 = sphi %s458_s6, %s599_s6  }
   0x5   : > { %p28_p0 = scmp.ge.s32.totalorder %s26_s13, 2  ;;  %s35_s14 = sadd.s32 1, %s430_s8 }
   0x6   : > { %p42_p1 = scmp.ne.s32.totalorder %s430_s8, %s426_s7  ;;  %p43_p2 = scmp.eq.s32.totalorder %s442_s11, 0 }
   0x7   : > { %s605_s13 = smov (%p28_p0, %s26_s13), 0  ;;  %p48_p4 = scmp.ne.s32.totalorder %s426_s7, %s422_s6 }
   0x8   : > { %p494_p3 = por %p43_p2, %p42_p1  ;;  %s30_s16 = ssub.s32 %s438_s10, %s605_s13 }
   0x9   : > { %p49_p5 = scmp.eq.s32.totalorder %s289_s12, 0  ;;  %p33_p6 = scmp.eq.s32.totalorder %s30_s16, 0 }
   0xa   : > { %p310_p8 = scmp.lt.s32.totalorder %s442_s11, 2  ;;  %s98_s19 = sand.u32 1, %s430_s8  }
   0xb   : > { %p501_p7 = por %p49_p5, %p48_p4  ;;  %s302_s20 = sshll.u32 %s438_s10, 10 }
   0xc   : > { %s507_s18 = scalar_select %p33_p6, %s430_s8, %s35_s14  }
   0xd   : > { %s293_s21 = sshll.u32 %s98_s19, 6  ;;  %s514_s24 = scalar_lea.hbm %s594_s0, %s302_s20 }
   0xe   : > { %s102_s25 = scalar_lea.vmem [#allocation3], %s293_s21  ;;  %p518_p9 = pnand %p310_p8, %p494_p3 }
   0xf   : > { %s111_s26 = sshll.u32 %s102_s25, 4  ;;  %s524_s28 = scalar_lea.sflag [#allocation4], %s98_s19  ;;  %s522_s26 = int_to_ptr.vmem [resolvable:$true] %s111_s26 }
  0x10   : > { %s362_s29 = scalar_lea.hbm %s514_s24, 1024  ;;  %p364_p11 = pneg %p518_p9 }
  0x11   : > { %p363_p10 = scmp.ne.s32.totalorder %s514_s24, %s362_s29  ;;  %s367_s3 = scalar_lea.hbm %s594_s0, 2048 }
  0x12   : > { %p368_p0 = scmp.lt.u32.totalorder %s514_s24, %s594_s0  ;;  %p369_p1 = scmp.lt.u32.totalorder %s367_s3, %s362_s29 }
  0x13   : > { %p365_p12 = pnand %p364_p11, %p363_p10  ;;  %p371_p3 = scmp.lt.u32.totalorder %s362_s29, %s514_s24 }
  0x14   : > { %p370_p2 = por %p369_p1, %p368_p0 }
  0x15   : > { %p366_p13 = pneg %p365_p12 }
  0x16   : > { %p372_p4 = por %p371_p3, %p370_p2 }
  0x18   : > { %p373_p5 = pnand %p372_p4, %p366_p13 }
  0x1a   : > { %376 = shalt.err (!%p373_p5)
}
  0x1b   : > { %s377_s6 = scalar_lea.vmem %s522_s26, 1024  ;;  %s444_s12 = smov [#allocation3]  }
  0x1c   : > { %p378_p6 = scmp.ne.s32.totalorder %s522_s26, %s377_s6  ;;  %s382_s14 = sshll.u32 %s444_s12, 4  ;;  %s383_s14 = int_to_ptr.vmem [resolvable:$false] %s382_s14 }
  0x1d   : > { %s384_s15 = scalar_lea.vmem %s383_s14, 2048  ;;  %p385_p12 = scmp.lt.s32.totalorder %s522_s26, %s383_s14 }
  0x1e   : > { %p380_p8 = pnand %p378_p6, %p364_p11  ;;  %p386_p0 = scmp.lt.s32.totalorder %s384_s15, %s377_s6 }
  0x20   : > { %p381_p10 = pneg %p380_p8  ;;  %p387_p1 = por %p386_p0, %p385_p12 }
  0x22   : > { %p388_p2 = pnand %p387_p1, %p381_p10 }
  0x24   : > { %391 = shalt.err (!%p388_p2)
}
  0x25   : > { %s445_s16 = smov 256   ;;  %s446_s19 = smov 16  }
  0x26   : > { %309 = dma.hbm_to_vmem [thread:$0]  (!%p518_p9), %s514_s24, 1024, %s522_s26, %s524_s28, %s445_s16, %s445_s16, %s446_s19  }
  0x27   : > { %p296_p11 = scmp.ge.s32.totalorder %s442_s11, 1  ;;  %p119_p13 = scmp.lt.s32.totalorder %s442_s11, 3 }
  0x29   : > { %p120_p3 = pnand %p296_p11, %p119_p13 }
  0x2a   : > { %s125_s20 = sand.u32 (!%p120_p3), 1, %s426_s7  }
  0x2b   : > { %123 = sbr.rel (%p120_p3) target bundleno = 214 (0xd6), region = 24  ;;  %s297_s21 = sshll.u32 (!%p120_p3), %s125_s20, 6 }
  0x2c   : > { %s126_s22 = scalar_lea.sflag (!%p120_p3), [#allocation4], %s125_s20  ;;  %s129_s23 = scalar_lea.vmem (!%p120_p3), [#allocation3], %s297_s21 }
  0x32   : > { %417 = dma.done.wait (%p501_p7), %s126_s22, 1024  }
  0x33   : > { %419 = vsyncadd (%p501_p7), %s126_s22, 4294966272  ;;  %vm158_vm0 = vcmask 7168   ;;  %v447_v0 = vmov 0.0   ;;  %v167_v1 = vld [vmem:[%s129_s23 + $0x20] sm:$0xff]  ;;  %v168_v2 = vld [vmem:[%s129_s23 + $0x28] sm:$0xff]  ;;  %p149_p7 = scmp.lt.s32.totalorder %s434_s9, 1 }
  0x34   : > { %161 = vst.msk [vmem:[#allocation2 + $0x10] sm:$0xff] %vm158_vm0, %v447_v0  ;;  %159 = vst.msk [vmem:[#allocation2] sm:$0xff] %vm158_vm0, %v447_v0  ;;  %v163_v3 = vld [vmem:[%s129_s23] sm:$0xff]  ;;  %v181_v4 = vadd.f32 %v168_v2, %v167_v1  ;;  %v164_v5 = vld [vmem:[%s129_s23 + $0x8] sm:$0xff] }
  0x35   : > { %160 = vst.msk [vmem:[#allocation2 + $0x8] sm:$0xff] %vm158_vm0, %v447_v0  ;;  %162 = vst.msk [vmem:[#allocation2 + $0x18] sm:$0xff] %vm158_vm0, %v447_v0  ;;  %v169_v6 = vld [vmem:[%s129_s23 + $0x30] sm:$0xff]  ;;  %v170_v7 = vld [vmem:[%s129_s23 + $0x38] sm:$0xff]  ;;  %v175_v8 = vadd.f32 %v164_v5, %v163_v3  ;;  %s607_s9 = smov (!%p149_p7, %s434_s9), 1 }
  0x36   : > { %v165_v9 = vld [vmem:[%s129_s23 + $0x10] sm:$0xff]  ;;  %v166_v10 = vld [vmem:[%s129_s23 + $0x18] sm:$0xff]  ;;  %182 = vadd.xlane.f32.xlu1 %v181_v4  ;;  %v184_v11 = vadd.f32 %v170_v7, %v169_v6  ;;  %s303_s17 = sshll.u32 %s607_s9, 5 }
  0x37   : > { %176 = vadd.xlane.f32.xlu0 %v175_v8  ;;  %v178_v12 = vadd.f32 %v166_v10, %v165_v9  ;;  %s153_s26 = scalar_lea.vmem %s595_s1, %s303_s17 }
  0x3a   : > { %185 = vadd.xlane.f32.xlu1 %v184_v11 }
  0x3b   : > { %179 = vadd.xlane.f32.xlu0 %v178_v12  ;;  %v173_v13 = vld [vmem:[#allocation2 + $0x10] sm:$0xff]  ;;  %v171_v14 = vld [vmem:[#allocation2] sm:$0xff] }
  0x3c   : > { %v174_v19 = vld [vmem:[#allocation2 + $0x18] sm:$0xff]  ;;  %v172_v20 = vld [vmem:[#allocation2 + $0x8] sm:$0xff] }
  0xc3   : > { %v183_v15 = vpop.xlane.xlu1 %182 }
  0xc4   : > { %v189_v16 = vadd.f32 %v183_v15, %v173_v13  ;;  %v177_v17 = vpop.xlane.xlu0 %176 }
  0xc5   : > { %v187_v18 = vadd.f32 %v177_v17, %v171_v14 }
  0xc6   : > { %194 = vst.msk [vmem:[#allocation2 + $0x10] sm:$0xff] %vm158_vm0, %v189_v16 }
  0xc7   : > { %192 = vst.msk [vmem:[#allocation2] sm:$0xff] %vm158_vm0, %v187_v18  ;;  %v186_v21 = vpop.xlane.xlu1 %185 }
  0xc8   : > { %v190_v22 = vadd.f32 %v186_v21, %v174_v19  ;;  %v180_v23 = vpop.xlane.xlu0 %179 }
  0xc9   : > { %v188_v24 = vadd.f32 %v180_v23, %v172_v20 }
  0xca   : > { %195 = vst.msk [vmem:[#allocation2 + $0x18] sm:$0xff] %vm158_vm0, %v190_v22 }
  0xcb   : > { %193 = vst.msk [vmem:[#allocation2 + $0x8] sm:$0xff] %vm158_vm0, %v188_v24 }
  0xcd   : > { %v201_v25 = vld [vmem:[#allocation2 + $0x10] sm:$0xff] }
  0xce   : > { %v205_v26 = vmul.f32 0.00390625, %v201_v25  ;;  %v199_v27 = vld [vmem:[#allocation2] sm:$0xff] }
  0xcf   : > { %v203_v28 = vmul.f32 0.00390625, %v199_v27 }
  0xd0   : > { %209 = vst.msk [vmem:[%s153_s26 + $0x10] sm:$0xff] %vm158_vm0, %v205_v26 }
  0xd1   : > { %207 = vst.msk [vmem:[%s153_s26] sm:$0xff] %vm158_vm0, %v203_v28  ;;  %v202_v29 = vld [vmem:[#allocation2 + $0x18] sm:$0xff] }
  0xd2   : > { %v206_v30 = vmul.f32 0.00390625, %v202_v29  ;;  %v200_v31 = vld [vmem:[#allocation2 + $0x8] sm:$0xff] }
  0xd3   : > { %v204_v32 = vmul.f32 0.00390625, %v200_v31 }
  0xd4   : > { %210 = vst.msk [vmem:[%s153_s26 + $0x18] sm:$0xff] %vm158_vm0, %v206_v30 }
  0xd5   : > { %208 = vst.msk [vmem:[%s153_s26 + $0x8] sm:$0xff] %vm158_vm0, %v204_v32 }
  0xd6 PF: > { %s14_s11 = sadd.s32 1, %s442_s11   ;;  %s599_s6 = smov %s426_s7 }
  0xd7   : > { %p11_p9 = scmp.ge.s32.totalorder %s14_s11, 4   ;;  %s600_s7 = smov %s430_s8 }
  0xd8   : > { %s601_s8 = smov %s507_s18  ;;  %s602_s9 = smov %s438_s10 }
  0xd9   : > { %s603_s10 = smov %s605_s13  ;;  %13 = sbr.rel (!%p11_p9) target bundleno = 4 (0x4), region = 72 }
  0xe0   :  { %232 = vsyncpa [#allocation4], 1 }
  0xe1   :  { %234 = vsyncpa [#allocation4 + $0x1], 1 }

</bundles_post_ra>
